<compile_context>
chip_gen: v7x
topology: tpu7x:2x2x1
jax: 0.10.0
libtpu: 0.0.40
codegen_flags: <defaults>
</compile_context>

<pallas_src>
import functools

import jax
import jax.numpy as jnp
from jax.experimental import pallas as pl
from jax.experimental.pallas import tpu as pltpu


def _choose_tile_t(t_total: int, bc: int, target_block_bytes: int = 2 << 20) -> int:
    """Pick a T-tile: full T if tiny, else a multiple of 8 sized to ~2 MiB blocks."""
    if t_total <= 8:
        return t_total
    tile = target_block_bytes // (bc * 4)
    tile = max(8, min(tile, t_total))
    tile = (tile // 8) * 8
    return tile


def _stats_kernel(x_ref, sum_ref, sumsq_ref, *, t_total: int, tile_t: int):
    """Accumulate per-(b,c) sum and sum-of-squares over the T grid axis."""
    i = pl.program_id(0)

    @pl.when(i == 0)
    def _():
        sum_ref[...] = jnp.zeros_like(sum_ref)
        sumsq_ref[...] = jnp.zeros_like(sumsq_ref)

    x = x_ref[...].astype(jnp.float32)                      # (tile_t, B*C)
    # Mask rows past the true T (partial last tile); where() avoids NaN * 0 issues
    # from unspecified padding data.
    row = jax.lax.broadcasted_iota(jnp.int32, x.shape, 0) + i * tile_t
    xm = jnp.where(row < t_total, x, 0.0)
    sum_ref[...] += jnp.sum(xm, axis=0, keepdims=True)
    sumsq_ref[...] += jnp.sum(xm * xm, axis=0, keepdims=True)


def _normalize_kernel(x_ref, scale_ref, shift_ref, o_ref):
    """y = x * scale + shift with per-(b,c) scale/shift rows broadcast over T."""
    o_ref[...] = (x_ref[...] * scale_ref[...] + shift_ref[...]).astype(o_ref.dtype)


def batch_norm_1d_tbc(x: jax.Array,
                      gamma: jax.Array,
                      beta: jax.Array,
                      *,
                      eps: float = 1e-5,
                      tile_t: int | None = None) -> jax.Array:
    """Training-mode BatchNorm1dTBC forward. x: [T, B, C] -> [T, B, C]."""
    T, B, C = x.shape
    BC = B * C
    x2d = x.reshape(T, BC)                                  # lane-dense layout

    if tile_t is None:
        tile_t = _choose_tile_t(T, BC)
    grid_t = pl.cdiv(T, tile_t)

    # ---- pass 1: per-(b, c) sum and sum of squares, reduced over T ----
    sums, sumsqs = pl.pallas_call(
        functools.partial(_stats_kernel, t_total=T, tile_t=tile_t),
        out_shape=(jax.ShapeDtypeStruct((1, BC), jnp.float32),
                   jax.ShapeDtypeStruct((1, BC), jnp.float32)),
        grid=(grid_t,),
        in_specs=[pl.BlockSpec((tile_t, BC), lambda i: (i, 0))],
        out_specs=(pl.BlockSpec((1, BC), lambda i: (0, 0)),
                   pl.BlockSpec((1, BC), lambda i: (0, 0))),
        compiler_params=pltpu.CompilerParams(
            dimension_semantics=("arbitrary",)),       # resident accumulators
        cost_estimate=pl.CostEstimate(flops=3 * T * BC, transcendentals=0,
                                      bytes_accessed=4 * T * BC),
    )(x2d)

    # ---- tiny (C,)-sized epilogue: fold batch into channel stats ----
    n = jnp.float32(T * B)
    ch_sum = jnp.sum(sums.reshape(B, C), axis=0)
    ch_sumsq = jnp.sum(sumsqs.reshape(B, C), axis=0)
    mean = ch_sum / n
    var = ch_sumsq / n - mean * mean                        # biased var (training)
    inv = jax.lax.rsqrt(var + jnp.float32(eps))
    scale = gamma.astype(jnp.float32) * inv
    shift = beta.astype(jnp.float32) - mean * scale

    # Broadcast per-channel scale/shift to the flattened (B*C,) lane layout.
    scale_row = jnp.tile(scale, B).reshape(1, BC)
    shift_row = jnp.tile(shift, B).reshape(1, BC)

    # ---- pass 2: y = x * scale + shift, tiled over T, megacore-parallel ----
    y2d = pl.pallas_call(
        _normalize_kernel,
        out_shape=jax.ShapeDtypeStruct((T, BC), x.dtype),
        grid=(grid_t,),
        in_specs=[pl.BlockSpec((tile_t, BC), lambda i: (i, 0)),
                  pl.BlockSpec((1, BC), lambda i: (0, 0)),
                  pl.BlockSpec((1, BC), lambda i: (0, 0))],
        out_specs=pl.BlockSpec((tile_t, BC), lambda i: (i, 0)),
        compiler_params=pltpu.CompilerParams(
            dimension_semantics=("parallel",)),
        cost_estimate=pl.CostEstimate(flops=2 * T * BC, transcendentals=0,
                                      bytes_accessed=8 * T * BC),
    )(x2d, scale_row, shift_row)

    return y2d.reshape(T, B, C)


def _reference(x, gamma, beta, eps=1e-5):
    """Plain-JAX training-mode BatchNorm1dTBC forward for verification."""
    mean = x.mean(axis=(0, 1))
    var = ((x - mean) ** 2).mean(axis=(0, 1))               # biased variance
    return (x - mean) * jax.lax.rsqrt(var + eps) * gamma + beta


if __name__ == "__main__":
    key = jax.random.PRNGKey(0)
    k1, k2, k3 = jax.random.split(key, 3)

    T, B, C = 16, 2, 8                                      # x: [T, B, C]
    x = jax.random.normal(k1, (T, B, C), dtype=jnp.float32)
    gamma = jax.random.normal(k2, (C,), dtype=jnp.float32)  # bn.weight
    beta = jax.random.normal(k3, (C,), dtype=jnp.float32)   # bn.bias

    y = batch_norm_1d_tbc(x, gamma, beta)
    y = jax.block_until_ready(y)

    ref = _reference(x, gamma, beta)
    assert y.shape == (T, B, C)
    assert y.dtype == jnp.float32
    assert jnp.allclose(y, ref, atol=1e-4, rtol=1e-4), "mismatch vs reference"

    print("KERNEL_OK")
</pallas_src>

<mosaic_0001>
module attributes {stable_mosaic.version = 11 : i64} {
  func.func @_stats_kernel(%arg0: i32, %arg1: memref<16x16xf32, #tpu.memory_space<vmem>>, %arg2: memref<1x16xf32, #tpu.memory_space<vmem>>, %arg3: memref<1x16xf32, #tpu.memory_space<vmem>>) attributes {dimension_semantics = [#tpu.dimension_semantics<arbitrary>], iteration_bounds = array<i64: 1>, scalar_prefetch = 0 : i64, scratch_operands = 0 : i64, tpu.core_type = #tpu.core_type<tc>, window_params = [{transform_indices = @transform_0, window_bounds = array<i64: 16, 16>}, {pipeline_mode = #tpu.pipeline_mode<synchronous>, transform_indices = @transform_1, window_bounds = array<i64: 1, 16>}, {pipeline_mode = #tpu.pipeline_mode<synchronous>, transform_indices = @transform_2, window_bounds = array<i64: 1, 16>}]} {
    %c0_i32 = arith.constant 0 : i32
    %0 = arith.cmpi eq, %arg0, %c0_i32 : i32
    %1 = arith.extui %0 : i1 to i32
    %c0_i32_0 = arith.constant 0 : i32
    %2 = arith.cmpi ne, %1, %c0_i32_0 : i32
    scf.if %2 {
      %cst_13 = arith.constant 0.000000e+00 : f32
      %23 = vector.broadcast %cst_13 : f32 to vector<1x16xf32>
      %c0_14 = arith.constant 0 : index
      %c0_15 = arith.constant 0 : index
      %24 = vector.load %arg2[%c0_14, %c0_15] : memref<1x16xf32, #tpu.memory_space<vmem>>, vector<1x16xf32>
      tpu.vector_store %arg2[%c0_14, %c0_15], %23 {strides = array<i32>} : memref<1x16xf32, #tpu.memory_space<vmem>>, vector<1x16xf32>,
      %cst_16 = arith.constant 0.000000e+00 : f32
      %25 = vector.broadcast %cst_16 : f32 to vector<1x16xf32>
      %c0_17 = arith.constant 0 : index
      %c0_18 = arith.constant 0 : index
      %26 = vector.load %arg3[%c0_17, %c0_18] : memref<1x16xf32, #tpu.memory_space<vmem>>, vector<1x16xf32>
      tpu.vector_store %arg3[%c0_17, %c0_18], %25 {strides = array<i32>} : memref<1x16xf32, #tpu.memory_space<vmem>>, vector<1x16xf32>,
    } else {
    }
    %c0 = arith.constant 0 : index
    %c0_1 = arith.constant 0 : index
    %3 = vector.load %arg1[%c0, %c0_1] : memref<16x16xf32, #tpu.memory_space<vmem>>, vector<16x16xf32>
    %4 = tpu.iota {dimensions = array<i32: 0>} : vector<16x16xi32>
    %c16_i32 = arith.constant 16 : i32
    %5 = arith.muli %arg0, %c16_i32 : i32
    %6 = vector.broadcast %5 : i32 to vector<16x16xi32>
    %7 = arith.addi %4, %6 : vector<16x16xi32>
    %c16_i32_2 = arith.constant 16 : i32
    %8 = vector.broadcast %c16_i32_2 : i32 to vector<16x16xi32>
    %9 = arith.cmpi slt, %7, %8 : vector<16x16xi32>
    %cst = arith.constant 0.000000e+00 : f32
    %10 = vector.broadcast %cst : f32 to vector<16x16xf32>
    %11 = arith.select %9, %3, %10 : vector<16x16xi1>, vector<16x16xf32>
    %c0_3 = arith.constant 0 : index
    %c0_4 = arith.constant 0 : index
    %12 = vector.load %arg2[%c0_3, %c0_4] : memref<1x16xf32, #tpu.memory_space<vmem>>, vector<1x16xf32>
    %cst_5 = arith.constant dense<0.000000e+00> : vector<16xf32>
    %13 = vector.multi_reduction <add>, %11, %cst_5 [0] : vector<16x16xf32> to vector<16xf32>
    %14 = vector.shape_cast %13 : vector<16xf32> to vector<1x16xf32>
    %15 = arith.addf %12, %14 : vector<1x16xf32>
    %c0_6 = arith.constant 0 : index
    %c0_7 = arith.constant 0 : index
    %16 = vector.load %arg2[%c0_6, %c0_7] : memref<1x16xf32, #tpu.memory_space<vmem>>, vector<1x16xf32>
    tpu.vector_store %arg2[%c0_6, %c0_7], %15 {strides = array<i32>} : memref<1x16xf32, #tpu.memory_space<vmem>>, vector<1x16xf32>,
    %c0_8 = arith.constant 0 : index
    %c0_9 = arith.constant 0 : index
    %17 = vector.load %arg3[%c0_8, %c0_9] : memref<1x16xf32, #tpu.memory_space<vmem>>, vector<1x16xf32>
    %18 = arith.mulf %11, %11 : vector<16x16xf32>
    %cst_10 = arith.constant dense<0.000000e+00> : vector<16xf32>
    %19 = vector.multi_reduction <add>, %18, %cst_10 [0] : vector<16x16xf32> to vector<16xf32>
    %20 = vector.shape_cast %19 : vector<16xf32> to vector<1x16xf32>
    %21 = arith.addf %17, %20 : vector<1x16xf32>
    %c0_11 = arith.constant 0 : index
    %c0_12 = arith.constant 0 : index
    %22 = vector.load %arg3[%c0_11, %c0_12] : memref<1x16xf32, #tpu.memory_space<vmem>>, vector<1x16xf32>
    tpu.vector_store %arg3[%c0_11, %c0_12], %21 {strides = array<i32>} : memref<1x16xf32, #tpu.memory_space<vmem>>, vector<1x16xf32>,
    return
  }
  func.func @transform_0(%arg0: i32) -> (i32, i32) {
    %c0_i32 = arith.constant 0 : i32
    %c0_i32_0 = arith.constant 0 : i32
    return %arg0, %c0_i32 : i32, i32
  }
  func.func @transform_1(%arg0: i32) -> (i32, i32) {
    %c0_i32 = arith.constant 0 : i32
    %c0_i32_0 = arith.constant 0 : i32
    %c0_i32_1 = arith.constant 0 : i32
    return %c0_i32, %c0_i32_0 : i32, i32
  }
  func.func @transform_2(%arg0: i32) -> (i32, i32) {
    %c0_i32 = arith.constant 0 : i32
    %c0_i32_0 = arith.constant 0 : i32
    %c0_i32_1 = arith.constant 0 : i32
    return %c0_i32, %c0_i32_0 : i32, i32
  }
}

</mosaic_0001>

<bundles_post_ra>
// kernel: tpu_custom_call.1
= control target key start
LH: loop header
LB: loop body
LE: loop exit
PB: predicated region body
PF: predicated region fallthrough
CT: control target
= control target key end

     0   :  { %8 = vsyncpa [#allocation3], 0  ;;  %s250_s0 = inlined_call_operand.hbm [shape: f32[16,16], index: 0, kind: input, shape index: {}]   ;;  %s251_s1 = inlined_call_operand.hbm [shape: f32[1,16], index: 1, kind: output, shape index: {0}]   ;;  %s252_s2 = inlined_call_operand.hbm [shape: f32[1,16], index: 2, kind: output, shape index: {1}]  }
   0x1   :  { %9 = vsyncpa [#allocation4], 0 }
   0x2   :  { %10 = vsyncpa [#allocation7], 0  ;;  %s181_s9 = smov [#allocation2]   ;;  %s109_s13 = scalar_lea.hbm %s250_s0, 256 }
   0x3   :  { %s16_s10 = sshll.u32 %s181_s9, 4  ;;  %p110_p0 = scmp.ne.s32.totalorder %s250_s0, %s109_s13  ;;  %s17_s10 = int_to_ptr.vmem [resolvable:$true] %s16_s10 }
   0x4   :  { %p113_p1 = scmp.lt.u32.totalorder %s109_s13, %s250_s0 }
   0x6   :  { %p115_p2 = pnand %p113_p1, %p110_p0 }
   0x8   :  { %118 = shalt.err (!%p115_p2)
}
   0x9   :  { %s119_s18 = scalar_lea.vmem %s17_s10, 256  ;;  %p124_p4 = scmp.lt.s32.totalorder %s17_s10, %s17_s10 }
   0xa   :  { %p120_p3 = scmp.ne.s32.totalorder %s17_s10, %s119_s18  ;;  %p125_p5 = scmp.lt.s32.totalorder %s119_s18, %s119_s18 }
   0xc   :  { %p126_p6 = por %p125_p5, %p124_p4 }
   0xe   :  { %p127_p7 = pnand %p126_p6, %p120_p3 }
  0x10   :  { %130 = shalt.err (!%p127_p7)
}
  0x11   :  { %s182_s19 = smov 128   ;;  %s183_s20 = smov 8  }
  0x12   :  { %22 = dma.hbm_to_vmem [thread:$0]  %s250_s0, 256, %s17_s10, [#allocation3], %s182_s19, %s182_s19, %s183_s20  }
  0x13   :  { %175 = dma.done.wait [#allocation3], 256  }
  0x14   :  { %176 = vsyncadd [#allocation3], 4294967040  ;;  %vm30_vm0 = vcmask 122880   ;;  %v184_v0 = vmov 0.0   ;;  %vm47_vm1 = vcmask 130048   ;;  %v33_v1 = vld [vmem:[#allocation2] sm:$0xff] }
  0x15   :  { %31 = vst.msk [vmem:[#allocation5] sm:$0x1] %vm30_vm0, %v184_v0  ;;  %32 = vst.msk [vmem:[#allocation6] sm:$0x1] %vm30_vm0, %v184_v0  ;;  %v34_v2 = vld [vmem:[#allocation2 + $0x8] sm:$0xff]  ;;  %v48_v3 = vsel %vm47_vm1, %v33_v1, 0.0  ;;  %v61_v5 = vmul.f32 %v33_v1, %v33_v1 }
  0x16   :  { %v49_v4 = vsel %vm47_vm1, %v34_v2, 0.0  ;;  %v62_v6 = vmul.f32 %v34_v2, %v34_v2  ;;  %s185_s0 = smov [#allocation5]   ;;  %s186_s24 = smov [#allocation6]  }
  0x17   :  { %v50_v7 = vadd.f32 %v49_v4, %v48_v3  ;;  %v63_v8 = vsel %vm47_vm1, %v61_v5, 0.0  ;;  %s80_s23 = sshll.u32 %s185_s0, 4  ;;  %s90_s25 = sshll.u32 %s186_s24, 4  ;;  %s81_s23 = int_to_ptr.vmem [resolvable:$true] %s80_s23  ;;  %s217_s25 = int_to_ptr.vmem [resolvable:$true] %s90_s25 }
  0x18   :  { %v64_v9 = vsel %vm47_vm1, %v62_v6, 0.0  ;;  %s131_s26 = scalar_lea.vmem %s81_s23, 16  ;;  %s135_s27 = scalar_lea.vmem %s81_s23, 32 }
  0x19   :  { %v51_v10 = vrot.slane %v50_v7, 4  ;;  %v65_v11 = vadd.f32 %v64_v9, %v63_v8  ;;  %p132_p8 = scmp.ne.s32.totalorder %s81_s23, %s131_s26  ;;  %p136_p9 = scmp.lt.s32.totalorder %s81_s23, %s81_s23 }
  0x1a   :  { %p137_p10 = scmp.lt.s32.totalorder %s135_s27, %s131_s26 }
  0x1b   :  { %v52_v12 = vadd.f32 %v51_v10, %v50_v7  ;;  %v66_v13 = vrot.slane %v65_v11, 4 }
  0x1c   :  { %v46_v20 = vld [vmem:[#allocation5] sm:$0x1]  ;;  %v60_v23 = vld [vmem:[#allocation6] sm:$0x1]  ;;  %p138_p11 = por %p137_p10, %p136_p9 }
  0x1d   :  { %v53_v14 = vrot.slane %v52_v12, 2  ;;  %v67_v15 = vadd.f32 %v66_v13, %v65_v11 }
  0x1e   :  { %p139_p12 = pnand %p138_p11, %p132_p8 }
  0x1f   :  { %v54_v16 = vadd.f32 %v53_v14, %v52_v12  ;;  %v68_v17 = vrot.slane %v67_v15, 2 }
  0x21   :  { %v55_v18 = vrot.slane %v54_v16, 1  ;;  %v69_v19 = vadd.f32 %v68_v17, %v67_v15 }
  0x23   :  { %v56_v21 = vadd.f32 %v55_v18, %v54_v16  ;;  %v70_v22 = vrot.slane %v69_v19, 1 }
  0x25   :  { %v57_v24 = vadd.f32 %v56_v21, %v46_v20  ;;  %v71_v25 = vadd.f32 %v70_v22, %v69_v19 }
  0x27   :  { %59 = vst.msk [vmem:[#allocation5] sm:$0x1] %vm30_vm0, %v57_v24  ;;  %v72_v26 = vadd.f32 %v71_v25, %v60_v23 }
  0x28   :  { %142 = shalt.err (!%p139_p12)
}
  0x29   :  { %s143_s30 = scalar_lea.hbm %s251_s1, 16 }
  0x2a   :  { %p144_p13 = scmp.ne.s32.totalorder %s251_s1, %s143_s30  ;;  %p147_p0 = scmp.lt.u32.totalorder %s143_s30, %s251_s1 }
  0x2c   :  { %p149_p1 = pnand %p147_p0, %p144_p13 }
  0x2e   :  { %152 = shalt.err (!%p149_p1)
}
  0x2f   :  { %83 = dma.vmem_to_hbm [thread:$0]  %s81_s23, 16, %s251_s1, [#allocation4]   ;;  %73 = vst.msk [vmem:[#allocation6] sm:$0x1] %vm30_vm0, %v72_v26 }
  0x30   :  { %s153_s9 = scalar_lea.vmem %s217_s25, 16  ;;  %s157_s10 = scalar_lea.vmem %s217_s25, 32 }
  0x31   :  { %p154_p2 = scmp.ne.s32.totalorder %s217_s25, %s153_s9  ;;  %p158_p3 = scmp.lt.s32.totalorder %s217_s25, %s217_s25 }
  0x32   :  { %p159_p4 = scmp.lt.s32.totalorder %s157_s10, %s153_s9 }
  0x34   :  { %p160_p5 = por %p159_p4, %p158_p3 }
  0x36   :  { %p161_p6 = pnand %p160_p5, %p154_p2 }
  0x38   :  { %164 = shalt.err (!%p161_p6)
}
  0x39   :  { %s165_s13 = scalar_lea.hbm %s252_s2, 16 }
  0x3a   :  { %p166_p7 = scmp.ne.s32.totalorder %s252_s2, %s165_s13  ;;  %p169_p8 = scmp.lt.u32.totalorder %s165_s13, %s252_s2 }
  0x3c   :  { %p171_p9 = pnand %p169_p8, %p166_p7 }
  0x3e   :  { %174 = shalt.err (!%p171_p9)
}
  0x3f   :  { %93 = dma.vmem_to_hbm [thread:$0]  %s217_s25, 16, %s252_s2, [#allocation7]  }
  0x40   :  { %177 = dma.done.wait [#allocation4], 16  }
  0x41   :  { %178 = vsyncadd [#allocation4], 4294967280 }
  0x42   :  { %179 = dma.done.wait [#allocation7], 16  }
  0x43   :  { %180 = vsyncadd [#allocation7], 4294967280 }
  0x44   :  { %100 = vsyncpa [#allocation3], 1 }
  0x45   :  { %101 = vsyncpa [#allocation4], 1 }
  0x46   :  { %102 = vsyncpa [#allocation7], 1 }

</bundles_post_ra>
